<compile_context>
chip_gen: v7x
topology: tpu7x:2x2x1
jax: 0.10.0
libtpu: 0.0.40
codegen_flags: <defaults>
</compile_context>

<pallas_src>
import functools
import math

import jax
import jax.numpy as jnp
from jax.experimental import pallas as pl
from jax.experimental.pallas import tpu as pltpu


def _composition_kernel(x_ref, w_ref, b_ref, out_ref, *, two_h):
    """One grid step: (block_b, Kf) @ (Kf, N_pad) + bias -> gated activations."""
    x = x_ref[...]                      # (block_b, Kf)   fused [input | hidden]
    w = w_ref[...]                      # (Kf, N_pad)     fused [w_x ; w_h], zero-padded cols
    b = b_ref[...]                      # (1, N_pad)

    net = jnp.dot(x, w, preferred_element_type=jnp.float32) + b   # (block_b, N_pad), f32

    # Gate select by lane index: cols [0, 2H) -> sigmoid (input/output gates),
    # cols [2H, ...) -> tanh (cell states; padded cols give tanh(0)=0, sliced off later).
    col = jax.lax.broadcasted_iota(jnp.int32, net.shape, dimension=1)
    act = jnp.where(col < two_h, jax.nn.sigmoid(net), jnp.tanh(net))

    out_ref[...] = act.astype(out_ref.dtype)


def composition_cell(x, h, w_x, w_h, b_x=None, *, block_b=256, matmul_dtype=None):
    """Pallas TPU forward of Composition_Cell.

    Args:
      x:    (B, input_size)  float32  -- `input`
      h:    (B, hidden_size) float32  -- `hidden_states`
      w_x:  (input_size, 3H) float32  (transposed nn.Linear weight)
      w_h:  (hidden_size, 3H) float32 (transposed nn.Linear weight, no bias)
      b_x:  optional (3H,) float32 bias of input_x
      block_b: batch tile size for the grid (weights stay VMEM-resident).
      matmul_dtype: optionally jnp.bfloat16 to feed the MXU bf16 operands
                    (accumulation and all elementwise math stay f32).
    Returns:
      (input_gate (B, H), output_gate (B, H), cell_states (B, H))
    """
    B, in_size = x.shape
    H = w_h.shape[0]
    three_h = 3 * H
    two_h = 2 * H
    Kf = in_size + H
    n_pad = ((three_h + 127) // 128) * 128        # lane-dense output width

    # ---- wrapper-side fusion / padding (done once, outside the kernel) ----
    xf = jnp.concatenate([x, h], axis=-1)                         # (B, Kf)
    wf = jnp.concatenate([w_x, w_h], axis=0)                      # (Kf, 3H)
    wf = jnp.pad(wf, ((0, 0), (0, n_pad - three_h)))              # (Kf, n_pad)
    bias = b_x if b_x is not None else jnp.zeros((three_h,), jnp.float32)
    bias = jnp.pad(bias, (0, n_pad - three_h)).reshape(1, n_pad)  # (1, n_pad)

    if matmul_dtype is not None:
        xf = xf.astype(matmul_dtype)
        wf = wf.astype(matmul_dtype)

    # ---- batch tiling (sublane constraint: block_b % 8 == 0 or == full B) ----
    bb = min(block_b, B)
    if bb != B:
        bb = max(8, (bb // 8) * 8)
    b_pad = pl.cdiv(B, bb) * bb
    if b_pad != B:
        xf = jnp.pad(xf, ((0, b_pad - B), (0, 0)))
    grid = (b_pad // bb,)

    kernel = functools.partial(_composition_kernel, two_h=two_h)

    out = pl.pallas_call(
        kernel,
        out_shape=jax.ShapeDtypeStruct((b_pad, n_pad), jnp.float32),
        grid=grid,
        in_specs=[
            pl.BlockSpec((bb, Kf), lambda i: (i, 0)),          # batch-tiled activations
            pl.BlockSpec((Kf, n_pad), lambda i: (0, 0)),       # VMEM-resident fused weight
            pl.BlockSpec((1, n_pad), lambda i: (0, 0)),        # VMEM-resident bias
        ],
        out_specs=pl.BlockSpec((bb, n_pad), lambda i: (i, 0)),
        compiler_params=pltpu.CompilerParams(
            dimension_semantics=("parallel",)),
    )(xf, wf, bias)

    out = out[:B]
    input_gate = out[:, :H]
    output_gate = out[:, H:two_h]
    cell_states = out[:, two_h:three_h]
    return input_gate, output_gate, cell_states


def _reference(x, h, w_x, w_h, b_x):
    """Pure-JAX mirror of the PyTorch forward, for verification."""
    net = x @ w_x + h @ w_h
    if b_x is not None:
        net = net + b_x
    H = w_h.shape[0]
    input_gate = jax.nn.sigmoid(net[:, :H])
    output_gate = jax.nn.sigmoid(net[:, H:2 * H])
    cell_states = jnp.tanh(net[:, 2 * H:3 * H])
    return input_gate, output_gate, cell_states


if __name__ == "__main__":
    # Small shapes consistent with the module.
    B, IN, H = 8, 32, 32   # batch, input_size, hidden_size

    key = jax.random.PRNGKey(0)
    k1, k2, k3, k4, k5 = jax.random.split(key, 5)

    x = jax.random.normal(k1, (B, IN), dtype=jnp.float32)
    h = jax.random.normal(k2, (B, H), dtype=jnp.float32)

    # Deterministic parameter init mirroring PyTorch nn.Linear defaults
    # (uniform(-1/sqrt(fan_in), 1/sqrt(fan_in))), stored pre-transposed as (fan_in, 3H).
    bound_x = 1.0 / math.sqrt(IN)
    w_x = jax.random.uniform(k3, (IN, 3 * H), jnp.float32, minval=-bound_x, maxval=bound_x)
    b_x = jax.random.uniform(k4, (3 * H,), jnp.float32, minval=-bound_x, maxval=bound_x)
    bound_h = 1.0 / math.sqrt(H)
    w_h = jax.random.uniform(k5, (H, 3 * H), jnp.float32, minval=-bound_h, maxval=bound_h)

    ig, og, cs = composition_cell(x, h, w_x, w_h, b_x)
    jax.block_until_ready((ig, og, cs))

    r_ig, r_og, r_cs = _reference(x, h, w_x, w_h, b_x)
    assert jnp.allclose(ig, r_ig, atol=1e-5, rtol=1e-5), "input_gate mismatch"
    assert jnp.allclose(og, r_og, atol=1e-5, rtol=1e-5), "output_gate mismatch"
    assert jnp.allclose(cs, r_cs, atol=1e-5, rtol=1e-5), "cell_states mismatch"

    print("KERNEL_OK")
</pallas_src>

<mosaic_0001>
module attributes {stable_mosaic.version = 11 : i64} {
  func.func @_composition_kernel(%arg0: i32, %arg1: memref<8x64xf32, #tpu.memory_space<vmem>>, %arg2: memref<64x128xf32, #tpu.memory_space<vmem>>, %arg3: memref<1x128xf32, #tpu.memory_space<vmem>>, %arg4: memref<8x128xf32, #tpu.memory_space<vmem>>) attributes {dimension_semantics = [#tpu.dimension_semantics<parallel>], iteration_bounds = array<i64: 1>, scalar_prefetch = 0 : i64, scratch_operands = 0 : i64, tpu.core_type = #tpu.core_type<tc>, window_params = [{transform_indices = @transform_0, window_bounds = array<i64: 8, 64>}, {pipeline_mode = #tpu.pipeline_mode<synchronous>, transform_indices = @transform_1, window_bounds = array<i64: 64, 128>}, {pipeline_mode = #tpu.pipeline_mode<synchronous>, transform_indices = @transform_2, window_bounds = array<i64: 1, 128>}, {transform_indices = @transform_3, window_bounds = array<i64: 8, 128>}]} {
    %c0 = arith.constant 0 : index
    %c0_0 = arith.constant 0 : index
    %0 = vector.load %arg1[%c0, %c0_0] : memref<8x64xf32, #tpu.memory_space<vmem>>, vector<8x64xf32>
    %c0_1 = arith.constant 0 : index
    %c0_2 = arith.constant 0 : index
    %1 = vector.load %arg2[%c0_1, %c0_2] : memref<64x128xf32, #tpu.memory_space<vmem>>, vector<64x128xf32>
    %c0_3 = arith.constant 0 : index
    %c0_4 = arith.constant 0 : index
    %2 = vector.load %arg3[%c0_3, %c0_4] : memref<1x128xf32, #tpu.memory_space<vmem>>, vector<1x128xf32>
    %cst = arith.constant dense<0.000000e+00> : vector<8x128xf32>
    %3 = tpu.matmul %0, %1, %cst {dimension_numbers = #tpu.dot_dimension_numbers<[1], [0], [0], [1], [0, 0, 1, 1], [], []>} : vector<8x64xf32>, vector<64x128xf32>, vector<8x128xf32> -> vector<8x128xf32>
    %4 = vector.broadcast %2 : vector<1x128xf32> to vector<8x128xf32>
    %5 = arith.addf %3, %4 : vector<8x128xf32>
    %6 = tpu.iota {dimensions = array<i32: 1>} : vector<8x128xi32>
    %c64_i32 = arith.constant 64 : i32
    %7 = vector.broadcast %c64_i32 : i32 to vector<8x128xi32>
    %8 = arith.cmpi slt, %6, %7 : vector<8x128xi32>
    %9 = arith.negf %5 : vector<8x128xf32>
    %10 = math.exp %9 : vector<8x128xf32>
    %cst_5 = arith.constant 1.000000e+00 : f32
    %11 = vector.broadcast %cst_5 : f32 to vector<8x128xf32>
    %12 = arith.addf %11, %10 : vector<8x128xf32>
    %13 = arith.divf %11, %12 : vector<8x128xf32>
    %14 = math.tanh %5 : vector<8x128xf32>
    %15 = arith.select %8, %13, %14 : vector<8x128xi1>, vector<8x128xf32>
    %c0_6 = arith.constant 0 : index
    %c0_7 = arith.constant 0 : index
    %16 = vector.load %arg4[%c0_6, %c0_7] : memref<8x128xf32, #tpu.memory_space<vmem>>, vector<8x128xf32>
    tpu.vector_store %arg4[%c0_6, %c0_7], %15 {strides = array<i32>} : memref<8x128xf32, #tpu.memory_space<vmem>>, vector<8x128xf32>,
    return
  }
  func.func @transform_0(%arg0: i32) -> (i32, i32) {
    %c0_i32 = arith.constant 0 : i32
    %c0_i32_0 = arith.constant 0 : i32
    return %arg0, %c0_i32 : i32, i32
  }
  func.func @transform_1(%arg0: i32) -> (i32, i32) {
    %c0_i32 = arith.constant 0 : i32
    %c0_i32_0 = arith.constant 0 : i32
    %c0_i32_1 = arith.constant 0 : i32
    return %c0_i32, %c0_i32_0 : i32, i32
  }
  func.func @transform_2(%arg0: i32) -> (i32, i32) {
    %c0_i32 = arith.constant 0 : i32
    %c0_i32_0 = arith.constant 0 : i32
    %c0_i32_1 = arith.constant 0 : i32
    return %c0_i32, %c0_i32_0 : i32, i32
  }
  func.func @transform_3(%arg0: i32) -> (i32, i32) {
    %c0_i32 = arith.constant 0 : i32
    %c0_i32_0 = arith.constant 0 : i32
    return %arg0, %c0_i32 : i32, i32
  }
}

</mosaic_0001>

<bundles_post_ra>
// kernel: tpu_custom_call.1
= control target key start
LH: loop header
LB: loop body
LE: loop exit
PB: predicated region body
PF: predicated region fallthrough
CT: control target
= control target key end

     0   :  { %8 = vsyncpa [#allocation3], 0  ;;  %s362_s0 = inlined_call_operand.hbm [shape: f32[8,64], index: 0, kind: input, shape index: {}]   ;;  %s363_s1 = inlined_call_operand.hbm [shape: f32[64,128], index: 1, kind: input, shape index: {}]   ;;  %s364_s2 = inlined_call_operand.vmem [shape: f32[1,128], index: 2, kind: input, shape index: {}]   ;;  %s365_s3 = inlined_call_operand.hbm [shape: f32[8,128], index: 3, kind: output, shape index: {}]  }
   0x1   :  { %9 = vsyncpa [#allocation6], 0 }
   0x2   :  { %10 = vsyncpa [#allocation4], 0  ;;  %s288_s12 = smov [#allocation2]   ;;  %s289_s14 = smov [#allocation5]  }
   0x3   :  { %s17_s13 = sshll.u32 %s288_s12, 4  ;;  %s26_s15 = sshll.u32 %s289_s14, 4  ;;  %s18_s13 = int_to_ptr.vmem [resolvable:$true] %s17_s13  ;;  %s316_s15 = int_to_ptr.vmem [resolvable:$true] %s26_s15 }
   0x4   :  { %s216_s18 = scalar_lea.hbm %s362_s0, 128 }
   0x5   :  { %p217_p0 = scmp.ne.s32.totalorder %s362_s0, %s216_s18  ;;  %p220_p1 = scmp.lt.u32.totalorder %s216_s18, %s362_s0 }
   0x7   :  { %p222_p2 = pnand %p220_p1, %p217_p0 }
   0x9   :  { %225 = shalt.err (!%p222_p2)
}
   0xa   :  { %s226_s23 = scalar_lea.vmem %s18_s13, 128  ;;  %p231_p4 = scmp.lt.s32.totalorder %s18_s13, %s18_s13 }
   0xb   :  { %p227_p3 = scmp.ne.s32.totalorder %s18_s13, %s226_s23  ;;  %p232_p5 = scmp.lt.s32.totalorder %s226_s23, %s226_s23 }
   0xd   :  { %p233_p6 = por %p232_p5, %p231_p4 }
   0xf   :  { %p234_p7 = pnand %p233_p6, %p227_p3 }
  0x11   :  { %237 = shalt.err (!%p234_p7)
}
  0x12   :  { %20 = dma.hbm_to_vmem [thread:$0]  %s362_s0, 128, %s18_s13, [#allocation3]  }
  0x13   :  { %s238_s28 = scalar_lea.hbm %s363_s1, 1024 }
  0x14   :  { %p239_p8 = scmp.ne.s32.totalorder %s363_s1, %s238_s28  ;;  %p242_p9 = scmp.lt.u32.totalorder %s238_s28, %s363_s1 }
  0x16   :  { %p244_p10 = pnand %p242_p9, %p239_p8 }
  0x18   :  { %247 = shalt.err (!%p244_p10)
}
  0x19   :  { %s248_s6 = scalar_lea.vmem %s316_s15, 1024  ;;  %p253_p12 = scmp.lt.s32.totalorder %s316_s15, %s316_s15 }
  0x1a   :  { %p249_p11 = scmp.ne.s32.totalorder %s316_s15, %s248_s6  ;;  %p254_p13 = scmp.lt.s32.totalorder %s248_s6, %s248_s6 }
  0x1c   :  { %p255_p0 = por %p254_p13, %p253_p12 }
  0x1e   :  { %p256_p1 = pnand %p255_p0, %p249_p11 }
  0x20   :  { %259 = shalt.err (!%p256_p1)
}
  0x21   :  { %s290_s0 = smov 128   ;;  %s291_s7 = smov 8  }
  0x22   :  { %32 = dma.hbm_to_vmem [thread:$0]  %s363_s1, 1024, %s316_s15, [#allocation6], %s290_s0, %s290_s0, %s291_s7  }
  0x23   :  { %282 = dma.done.wait [#allocation3], 128  }
  0x24   :  { %283 = vsyncadd [#allocation3], 4294967168 }
  0x25   :  { %284 = dma.done.wait [#allocation6], 1024  }
  0x26   :  { %285 = vsyncadd [#allocation6], 4294966272  ;;  %v292_v0 = vmov 0.0|0.0   ;;  %vm293_vm0 = vmmov 0   ;;  %v294_v1 = vmov 0.0   ;;  %v42_v2 = vld [vmem:[#allocation5] sm:$0xff]  ;;  %v131_v22 = vlaneseq }
  0x27   :  { %190 = vmatprep.subr.bf16.mxu0 %v292_v0  ;;  %187 = vmatprep.mubr.msk.f32.mxu0 %vm293_vm0, %v294_v1  ;;  %v43_v3 = vld [vmem:[#allocation5 + $0x8] sm:$0xff]  ;;  %v44_v4 = vld [vmem:[#allocation5 + $0x10] sm:$0xff]  ;;  %v45_v6 = vld [vmem:[#allocation5 + $0x18] sm:$0xff]  ;;  %vm57_vm1 = vcmask 523264   ;;  %s295_s11 = smov [#allocation7]  }
  0x28   :  { %v191_v5 = vpack.c.bf16 %v43_v3, %v42_v2  ;;  %v194_v7 = vpack.c.bf16 %v45_v6, %v44_v4  ;;  %v46_v8 = vld [vmem:[#allocation5 + $0x20] sm:$0xff]  ;;  %v47_v9 = vld [vmem:[#allocation5 + $0x28] sm:$0xff]  ;;  %v48_v11 = vld [vmem:[#allocation5 + $0x30] sm:$0xff]  ;;  %v132_v23 = vand.u32 127, %v131_v22  ;;  %s149_s12 = sshll.u32 %s295_s11, 4  ;;  %s150_s12 = int_to_ptr.vmem [resolvable:$true] %s149_s12 }
  0x29   :  { %v197_v10 = vpack.c.bf16 %v47_v9, %v46_v8  ;;  %v49_v12 = vld [vmem:[#allocation5 + $0x38] sm:$0xff]  ;;  %p265_p3 = scmp.lt.s32.totalorder %s150_s12, %s150_s12 }
  0x2a   :  { %192 = vmatpush3.bf16.msra.mxu0 %v191_v5  ;;  %v200_v13 = vpack.c.bf16 %v49_v12, %v48_v11  ;;  %v41_v14 = vld [vmem:[#allocation2] sm:$0xff]  ;;  %vm133_vm2 = vcmp.lt.s32.totalorder %v132_v23, 64 }
  0x2b   :  { %193 = vmatprep.subr.bf16.mxu0 %v292_v0  ;;  %v159_v15 = vld [vmem:[%s364_s2] ss:$0 sm:$0xff]  ;;  %s260_s2 = scalar_lea.vmem %s150_s12, 128 }
  0x2c   :  { %p261_p2 = scmp.ne.s32.totalorder %s150_s12, %s260_s2  ;;  %p266_p4 = scmp.lt.s32.totalorder %s260_s2, %s260_s2 }
  0x2e   :  { %195 = vmatpush3.bf16.msra.mxu0 %v194_v7  ;;  %p267_p5 = por %p266_p4, %p265_p3 }
  0x2f   :  { %196 = vmatprep.subr.bf16.mxu0 %v292_v0 }
  0x30   :  { %p268_p6 = pnand %p267_p5, %p261_p2 }
  0x32   :  { %198 = vmatpush3.bf16.msra.mxu0 %v197_v10 }
  0x33   :  { %199 = vmatprep.subr.bf16.mxu0 %v292_v0 }
  0x36   :  { %201 = vmatpush3.bf16.msra.mxu0 %v200_v13 }
  0x39   :  { %188 = vmatmul.mubr.msk.f32.vlgmr.msra.gmra.mrb[0].mxu0 %vm57_vm1, %v41_v14 }
 0x10c   :  { %v127_v16 = vpop.f32.mrb[0].mxu0 }
 0x10d   :  { %v128_v17 = vadd.f32 %v159_v15, %v127_v16  ;;  %v189_v18 = vpop.f32.mrb[1].mxu0 }
 0x10f   :  { %v161_v19 = vmul.f32 -1.442695, %v128_v17 }
 0x111   :  { %210 = vpow2.f32 %v161_v19 }
 0x112   :  { %212 = vtanh.f32 %v128_v17 }
 0x11b   :  { %v211_v20 = vpop.eup %210 }
 0x11c   :  { %v137_v21 = vadd.f32 1.0, %v211_v20  ;;  %v213_v24 = vpop.eup %212 }
 0x11e   :  { %214 = vrcp.f32 %v137_v21 }
 0x128   :  { %v215_v25 = vpop.eup %214 }
 0x129   :  { %v141_v26 = vsel %vm133_vm2, %v215_v25, %v213_v24 }
 0x12a   :  { %142 = vst [vmem:[#allocation7] sm:$0xff] %v141_v26 }
 0x12b   :  { %271 = shalt.err (!%p268_p6)
}
 0x12c   :  { %s272_s15 = scalar_lea.hbm %s365_s3, 128 }
 0x12d   :  { %p273_p7 = scmp.ne.s32.totalorder %s365_s3, %s272_s15  ;;  %p276_p8 = scmp.lt.u32.totalorder %s272_s15, %s365_s3 }
 0x12f   :  { %p278_p9 = pnand %p276_p8, %p273_p7 }
 0x131   :  { %281 = shalt.err (!%p278_p9)
}
 0x132   :  { %152 = dma.vmem_to_hbm [thread:$0]  %s150_s12, 128, %s365_s3, [#allocation4]  }
 0x133   :  { %286 = dma.done.wait [#allocation4], 128  }
 0x134   :  { %287 = vsyncadd [#allocation4], 4294967168 }
 0x135   :  { %156 = vsyncpa [#allocation3], 1 }
 0x136   :  { %157 = vsyncpa [#allocation6], 1 }
 0x137   :  { %158 = vsyncpa [#allocation4], 1 }

</bundles_post_ra>
